<compile_context>
chip_gen: v7x
topology: tpu7x:2x2x1
jax: 0.10.0
libtpu: 0.0.40
codegen_flags: <defaults>
</compile_context>

<pallas_src>
import jax
import jax.numpy as jnp
from jax.experimental import pallas as pl
from jax.experimental.pallas import tpu as pltpu


_VMEM_LIMIT_BYTES = 32 << 20          # safe request on every generation
_TARGET_TILE_BYTES = 8 << 20          # input-tile budget (3x when double-buffered)


# ------------------------------------------------------------------ kernel ---

def _temporal_max_pool_kernel(x_ref, o_ref):
    """x_ref: (Bt, S, Ft) tile, o_ref: (Bt, S//2, Ft) tile.

    out[:, t, :] = max(x[:, 2t-1 : 2t+2, :]) with the t=0 window clipped,
    i.e. max_pool1d(kernel=3, stride=2, padding=1) along the segment axis.
    The segment axis is tiny and static, so the window loop fully unrolls.
    """
    x = x_ref[...]                      # native dtype; max-pool needs no widening
    s = x_ref.shape[1]
    t_out = o_ref.shape[1]

    cols = []
    for t in range(t_out):              # t_out is small & static (n_segment // 2)
        lo = max(2 * t - 1, 0)          # padded index -1 drops out of the window
        hi = min(2 * t + 2, s)
        cols.append(jnp.max(x[:, lo:hi, :], axis=1, keepdims=True))
    o_ref[...] = cols[0] if t_out == 1 else jnp.concatenate(cols, axis=1)


# ----------------------------------------------------------------- tiling ---

def _choose_tiles(n_batch, n_segment, feat, itemsize,
                  target_bytes=_TARGET_TILE_BYTES):
    """Pick (Bt, Ft) so one input tile is ~target_bytes and lane-dense.

    Ft must be a multiple of 128 (or the full feature dim); Bt fills the rest
    of the budget.  Double-buffered in+out footprint ~= 3 * target_bytes.
    """
    if feat % 128 == 0:
        max_ft = max(128, (target_bytes // (n_segment * itemsize)) // 128 * 128)
        ft = min(feat, max_ft)
    else:
        ft = feat                       # full-dim block satisfies the (8,128) rule
    per_batch = n_segment * ft * itemsize
    bt = int(max(1, min(n_batch, target_bytes // max(per_batch, 1))))
    return bt, ft


# ---------------------------------------------------------------- wrapper ---

def temporal_pool_pallas(x, n_segment):
    """Pallas implementation of TemporalPool.temporal_pool (always uses the kernel)."""
    nt, c, h, w = x.shape
    assert nt % n_segment == 0, "nt must be a multiple of n_segment"
    assert n_segment % 2 == 0, "TemporalPool assumes an even n_segment (output nt // 2)"
    n_batch = nt // n_segment
    t_out = n_segment // 2
    feat = c * h * w
    itemsize = jnp.dtype(x.dtype).itemsize

    xr = x.reshape(n_batch, n_segment, feat)
    bt, ft = _choose_tiles(n_batch, n_segment, feat, itemsize)
    grid = (pl.cdiv(n_batch, bt), pl.cdiv(feat, ft))

    in_bytes = n_batch * n_segment * feat * itemsize
    out_bytes = n_batch * t_out * feat * itemsize

    out = pl.pallas_call(
        _temporal_max_pool_kernel,
        out_shape=jax.ShapeDtypeStruct((n_batch, t_out, feat), x.dtype),
        grid_spec=pltpu.PrefetchScalarGridSpec(
            num_scalar_prefetch=0,
            grid=grid,
            in_specs=[pl.BlockSpec((bt, n_segment, ft), lambda bi, fi: (bi, 0, fi))],
            out_specs=pl.BlockSpec((bt, t_out, ft), lambda bi, fi: (bi, 0, fi)),
        ),
        compiler_params=pltpu.CompilerParams(
            # Both grid axes are independent -> megacore-shardable.
            dimension_semantics=("parallel", "parallel"),
            vmem_limit_bytes=_VMEM_LIMIT_BYTES,
        ),
        cost_estimate=pl.CostEstimate(
            flops=n_batch * n_segment * feat,     # ~1 compare per input element
            transcendentals=0,
            bytes_accessed=in_bytes + out_bytes,
        ),
    )(xr)
    return out.reshape(n_batch * t_out, c, h, w)


def _temporal_pool_ref(x, n_segment):
    """Pure-JAX reference (also the small-/awkward-input fast path)."""
    nt, c, h, w = x.shape
    n_batch = nt // n_segment
    t_out = n_segment // 2
    xv = x.reshape(n_batch, n_segment, c, h, w)
    cols = []
    for t in range(t_out):
        lo = max(2 * t - 1, 0)
        hi = min(2 * t + 2, n_segment)
        cols.append(jnp.max(xv[:, lo:hi], axis=1))
    return jnp.stack(cols, axis=1).reshape(n_batch * t_out, c, h, w)


def temporal_pool(x, n_segment, *, min_pallas_bytes=1 << 20):
    """Dispatcher.

    Tiny tensors skip pallas_call (fixed launch overhead dominates), and
    shapes whose feature dim is both huge and not 128-aligned (un-tileable
    last dim => single oversized block) fall back to the fused XLA path.
    """
    nt, c, h, w = x.shape
    feat = c * h * w
    itemsize = jnp.dtype(x.dtype).itemsize
    if x.size * itemsize < min_pallas_bytes:
        return _temporal_pool_ref(x, n_segment)
    if feat % 128 != 0 and n_segment * feat * itemsize > _TARGET_TILE_BYTES:
        return _temporal_pool_ref(x, n_segment)
    return temporal_pool_pallas(x, n_segment)


class TemporalPool:
    """JAX/Pallas port of the PyTorch TemporalPool module.

    `net` may be any JAX callable applied to the pooled tensor (identity by default).
    """
    # TODO(synk): the wrapped torch `net` submodule is arbitrary and is not
    # translated here; pass an equivalent JAX callable as `net`.

    def __init__(self, net=None, n_segment=8):
        self.net = net if net is not None else (lambda y: y)
        self.n_segment = n_segment

    def __call__(self, x):
        pooled = temporal_pool(x, self.n_segment)
        return self.net(pooled)


# ------------------------------------------------------------------- main ---

if __name__ == "__main__":
    key = jax.random.PRNGKey(0)
    n_batch, n_segment, c, h, w = 2, 8, 4, 16, 16
    nt = n_batch * n_segment                      # 16
    x = jax.random.normal(key, (nt, c, h, w), dtype=jnp.float32)

    # Force the Pallas kernel path once and check against the JAX reference.
    out = jax.block_until_ready(temporal_pool_pallas(x, n_segment))
    ref = jax.block_until_ready(_temporal_pool_ref(x, n_segment))
    assert out.shape == (nt // 2, c, h, w), out.shape
    assert jnp.allclose(out, ref), "Pallas temporal pool mismatch vs reference"

    # Also exercise a multi-tile grid (several batch blocks x feature blocks).
    key2 = jax.random.PRNGKey(1)
    x_big = jax.random.normal(key2, (8 * n_segment, 8, 32, 32), dtype=jnp.float32)
    out_big = jax.block_until_ready(temporal_pool_pallas(x_big, n_segment))
    ref_big = jax.block_until_ready(_temporal_pool_ref(x_big, n_segment))
    assert out_big.shape == ref_big.shape
    assert jnp.allclose(out_big, ref_big), "Pallas temporal pool mismatch (big case)"

    # Module wrapper (identity net) sanity check — small input takes the fast path.
    mod = TemporalPool(net=lambda y: y, n_segment=n_segment)
    out_mod = jax.block_until_ready(mod(x))
    assert out_mod.shape == (nt // 2, c, h, w)
    assert jnp.allclose(out_mod, ref)

    print("KERNEL_OK")
</pallas_src>

<mosaic_0001>
module attributes {stable_mosaic.version = 11 : i64} {
  func.func @_temporal_max_pool_kernel(%arg0: i32, %arg1: i32, %arg2: memref<2x8x1024xf32, #tpu.memory_space<vmem>>, %arg3: memref<2x4x1024xf32, #tpu.memory_space<vmem>>) attributes {dimension_semantics = [#tpu.dimension_semantics<parallel>, #tpu.dimension_semantics<parallel>], iteration_bounds = array<i64: 1, 1>, scalar_prefetch = 0 : i64, scratch_operands = 0 : i64, tpu.core_type = #tpu.core_type<tc>, window_params = [{transform_indices = @transform_0, window_bounds = array<i64: 2, 8, 1024>}, {transform_indices = @transform_1, window_bounds = array<i64: 2, 4, 1024>}]} {
    %c0 = arith.constant 0 : index
    %c0_0 = arith.constant 0 : index
    %c0_1 = arith.constant 0 : index
    %0 = vector.load %arg2[%c0, %c0_0, %c0_1] : memref<2x8x1024xf32, #tpu.memory_space<vmem>>, vector<2x8x1024xf32>
    %1 = vector.extract_strided_slice %0 {offsets = [0, 0, 0], sizes = [2, 2, 1024], strides = [1, 1, 1]} : vector<2x8x1024xf32> to vector<2x2x1024xf32>
    %cst = arith.constant dense<0xFF800000> : vector<2x1024xf32>
    %2 = vector.multi_reduction <maximumf>, %1, %cst [1] : vector<2x2x1024xf32> to vector<2x1024xf32>
    %3 = vector.shape_cast %2 : vector<2x1024xf32> to vector<2x1x1024xf32>
    %4 = vector.extract_strided_slice %0 {offsets = [0, 1, 0], sizes = [2, 3, 1024], strides = [1, 1, 1]} : vector<2x8x1024xf32> to vector<2x3x1024xf32>
    %cst_2 = arith.constant dense<0xFF800000> : vector<2x1024xf32>
    %5 = vector.multi_reduction <maximumf>, %4, %cst_2 [1] : vector<2x3x1024xf32> to vector<2x1024xf32>
    %6 = vector.shape_cast %5 : vector<2x1024xf32> to vector<2x1x1024xf32>
    %7 = vector.extract_strided_slice %0 {offsets = [0, 3, 0], sizes = [2, 3, 1024], strides = [1, 1, 1]} : vector<2x8x1024xf32> to vector<2x3x1024xf32>
    %cst_3 = arith.constant dense<0xFF800000> : vector<2x1024xf32>
    %8 = vector.multi_reduction <maximumf>, %7, %cst_3 [1] : vector<2x3x1024xf32> to vector<2x1024xf32>
    %9 = vector.shape_cast %8 : vector<2x1024xf32> to vector<2x1x1024xf32>
    %10 = vector.extract_strided_slice %0 {offsets = [0, 5, 0], sizes = [2, 3, 1024], strides = [1, 1, 1]} : vector<2x8x1024xf32> to vector<2x3x1024xf32>
    %cst_4 = arith.constant dense<0xFF800000> : vector<2x1024xf32>
    %11 = vector.multi_reduction <maximumf>, %10, %cst_4 [1] : vector<2x3x1024xf32> to vector<2x1024xf32>
    %12 = vector.shape_cast %11 : vector<2x1024xf32> to vector<2x1x1024xf32>
    %13 = tpu.concatenate %3, %6, %9, %12 in 1 : vector<2x1x1024xf32>, vector<2x1x1024xf32>, vector<2x1x1024xf32>, vector<2x1x1024xf32> -> vector<2x4x1024xf32>
    %c0_5 = arith.constant 0 : index
    %c0_6 = arith.constant 0 : index
    %c0_7 = arith.constant 0 : index
    %14 = vector.load %arg3[%c0_5, %c0_6, %c0_7] : memref<2x4x1024xf32, #tpu.memory_space<vmem>>, vector<2x4x1024xf32>
    tpu.vector_store %arg3[%c0_5, %c0_6, %c0_7], %13 {strides = array<i32>} : memref<2x4x1024xf32, #tpu.memory_space<vmem>>, vector<2x4x1024xf32>,
    return
  }
  func.func @transform_0(%arg0: i32, %arg1: i32) -> (i32, i32, i32) {
    %c0_i32 = arith.constant 0 : i32
    %c0_i32_0 = arith.constant 0 : i32
    return %arg0, %c0_i32, %arg1 : i32, i32, i32
  }
  func.func @transform_1(%arg0: i32, %arg1: i32) -> (i32, i32, i32) {
    %c0_i32 = arith.constant 0 : i32
    %c0_i32_0 = arith.constant 0 : i32
    return %arg0, %c0_i32, %arg1 : i32, i32, i32
  }
}

</mosaic_0001>

<bundles_post_ra>
// kernel: tpu_custom_call.1
= control target key start
LH: loop header
LB: loop body
LE: loop exit
PB: predicated region body
PF: predicated region fallthrough
CT: control target
= control target key end

     0   :  { %6 = vsyncpa [#allocation3], 0  ;;  %s870_s0 = inlined_call_operand.hbm [shape: f32[2,8,1024], index: 0, kind: input, shape index: {}]   ;;  %s871_s1 = inlined_call_operand.hbm [shape: f32[2,4,1024], index: 1, kind: output, shape index: {}]  }
   0x1   :  { %7 = vsyncpa [#allocation4], 0  ;;  %s652_s6 = smov [#allocation2]   ;;  %s604_s10 = scalar_lea.hbm %s870_s0, 2048 }
   0x2   :  { %s13_s7 = sshll.u32 %s652_s6, 4  ;;  %p605_p0 = scmp.ne.s32.totalorder %s870_s0, %s604_s10  ;;  %s14_s7 = int_to_ptr.vmem [resolvable:$true] %s13_s7 }
   0x3   :  { %p608_p1 = scmp.lt.u32.totalorder %s604_s10, %s870_s0 }
   0x5   :  { %p610_p2 = pnand %p608_p1, %p605_p0 }
   0x7   :  { %613 = shalt.err (!%p610_p2)
}
   0x8   :  { %s614_s15 = scalar_lea.vmem %s14_s7, 2048  ;;  %p619_p4 = scmp.lt.s32.totalorder %s14_s7, %s14_s7 }
   0x9   :  { %p615_p3 = scmp.ne.s32.totalorder %s14_s7, %s614_s15  ;;  %p620_p5 = scmp.lt.s32.totalorder %s614_s15, %s614_s15 }
   0xb   :  { %p621_p6 = por %p620_p5, %p619_p4 }
   0xd   :  { %p622_p7 = pnand %p621_p6, %p615_p3 }
   0xf   :  { %625 = shalt.err (!%p622_p7)
}
  0x10   :  { %s653_s16 = smov 1024   ;;  %s654_s17 = smov 64  }
  0x11   :  { %19 = dma.hbm_to_vmem [thread:$0]  %s870_s0, 2048, %s14_s7, [#allocation3], %s653_s16, %s653_s16, %s654_s17  }
  0x12   :  { %648 = dma.done.wait [#allocation3], 2048  }
  0x13   :  { %649 = vsyncadd [#allocation3], 4294965248  ;;  %vm39_vm0 = vcmask 1041408   ;;  %vm152_vm1 = vcmask 1043457   ;;  %v23_v0 = vld [vmem:[#allocation2] sm:$0xff]  ;;  %v24_v1 = vld [vmem:[#allocation2 + $0x8] sm:$0xff] }
  0x14   :  { %vm265_vm2 = vcmask 1045507   ;;  %vm378_vm3 = vcmask 1047557   ;;  %v40_v2 = vsel %vm39_vm0, %v23_v0, -inf  ;;  %v47_v3 = vsel %vm39_vm0, %v24_v1, -inf  ;;  %v25_v46 = vld [vmem:[#allocation2 + $0x10] sm:$0xff]  ;;  %v26_v47 = vld [vmem:[#allocation2 + $0x18] sm:$0xff] }
  0x15   :  { %v153_v4 = vsel %vm152_vm1, %v23_v0, -inf  ;;  %v160_v5 = vsel %vm152_vm1, %v24_v1, -inf  ;;  %v41_v6 = vrot.slane %v40_v2, 4  ;;  %v48_v7 = vrot.slane %v47_v3, 4  ;;  %s655_s0 = smov [#allocation5]  }
  0x16   :  { %v154_v8 = vrot.slane %v153_v4, 4  ;;  %v161_v9 = vrot.slane %v160_v5, 4  ;;  %v266_v10 = vsel %vm265_vm2, %v23_v0, -inf  ;;  %v273_v11 = vsel %vm265_vm2, %v24_v1, -inf  ;;  %s586_s20 = sshll.u32 %s655_s0, 4  ;;  %s587_s20 = int_to_ptr.vmem [resolvable:$true] %s586_s20 }
  0x17   :  { %v379_v12 = vsel %vm378_vm3, %v23_v0, -inf  ;;  %v386_v13 = vsel %vm378_vm3, %v24_v1, -inf  ;;  %vm491_vm4 = vcmask 1040384   ;;  %v42_v14 = vmax.f32 %v40_v2, %v41_v6  ;;  %s626_s21 = scalar_lea.vmem %s587_s20, 1024  ;;  %p631_p9 = scmp.lt.s32.totalorder %s587_s20, %s587_s20 }
  0x18   :  { %v49_v15 = vmax.f32 %v47_v3, %v48_v7  ;;  %v155_v16 = vmax.f32 %v153_v4, %v154_v8  ;;  %v162_v17 = vmax.f32 %v160_v5, %v161_v9  ;;  %v267_v18 = vrot.slane %v266_v10, 4  ;;  %p627_p8 = scmp.ne.s32.totalorder %s587_s20, %s626_s21  ;;  %p632_p10 = scmp.lt.s32.totalorder %s626_s21, %s626_s21 }
  0x19   :  { %v274_v19 = vrot.slane %v273_v11, 4  ;;  %v380_v20 = vrot.slane %v379_v12, 4  ;;  %v387_v21 = vrot.slane %v386_v13, 4  ;;  %v43_v22 = vrot.slane %v42_v14, 2 }
  0x1a   :  { %v50_v23 = vrot.slane %v49_v15, 2  ;;  %v156_v24 = vrot.slane %v155_v16, 2  ;;  %v163_v25 = vrot.slane %v162_v17, 2  ;;  %v268_v26 = vmax.f32 %v266_v10, %v267_v18  ;;  %p633_p11 = por %p632_p10, %p631_p9 }
  0x1b   :  { %v275_v27 = vmax.f32 %v273_v11, %v274_v19  ;;  %v381_v28 = vmax.f32 %v379_v12, %v380_v20  ;;  %v388_v29 = vmax.f32 %v386_v13, %v387_v21  ;;  %vm524_vm5 = vcmask 1042432  }
  0x1c   :  { %v44_v30 = vmax.f32 %v42_v14, %v43_v22  ;;  %v51_v31 = vmax.f32 %v49_v15, %v50_v23  ;;  %v157_v32 = vmax.f32 %v155_v16, %v156_v24  ;;  %v164_v33 = vmax.f32 %v162_v17, %v163_v25  ;;  %p634_p12 = pnand %p633_p11, %p627_p8 }
  0x1d   :  { %v269_v34 = vrot.slane %v268_v26, 2  ;;  %v276_v35 = vrot.slane %v275_v27, 2  ;;  %v382_v36 = vrot.slane %v381_v28, 2  ;;  %v389_v37 = vrot.slane %v388_v29, 2 }
  0x1e   :  { %v45_v38 = vrot.slane %v44_v30, 1  ;;  %v52_v39 = vrot.slane %v51_v31, 1  ;;  %v158_v40 = vrot.slane %v157_v32, 1  ;;  %v165_v41 = vrot.slane %v164_v33, 1 }
  0x1f   :  { %v270_v42 = vmax.f32 %v268_v26, %v269_v34  ;;  %v277_v43 = vmax.f32 %v275_v27, %v276_v35  ;;  %v383_v44 = vmax.f32 %v381_v28, %v382_v36  ;;  %v390_v45 = vmax.f32 %v388_v29, %v389_v37 }
  0x20   :  { %v46_v48 = vmax.f32 %v44_v30, %v45_v38  ;;  %v53_v49 = vmax.f32 %v51_v31, %v52_v39  ;;  %v159_v50 = vmax.f32 %v157_v32, %v158_v40  ;;  %v166_v51 = vmax.f32 %v164_v33, %v165_v41  ;;  %v27_v40 = vld [vmem:[#allocation2 + $0x20] sm:$0xff]  ;;  %v702_v41 = vld [vmem:[#allocation2 + $0x28] sm:$0xff] }
  0x21   :  { %v271_v52 = vrot.slane %v270_v42, 1  ;;  %v278_v53 = vrot.slane %v277_v43, 1  ;;  %v384_v54 = vrot.slane %v383_v44, 1  ;;  %v391_v55 = vrot.slane %v390_v45, 1 }
  0x22   :  { %v492_v56 = vsel %vm491_vm4, %v46_v48, %v159_v50  ;;  %v493_v57 = vsel %vm491_vm4, %v53_v49, %v166_v51  ;;  %v54_v58 = vsel %vm39_vm0, %v25_v46, -inf  ;;  %v61_v59 = vsel %vm39_vm0, %v26_v47, -inf }
  0x23   :  { %v272_v60 = vmax.f32 %v270_v42, %v271_v52  ;;  %v279_v61 = vmax.f32 %v277_v43, %v278_v53  ;;  %v385_v62 = vmax.f32 %v383_v44, %v384_v54  ;;  %v392_v63 = vmax.f32 %v390_v45, %v391_v55 }
  0x24   :  { %v55_v0 = vrot.slane %v54_v58, 4  ;;  %v62_v1 = vrot.slane %v61_v59, 4  ;;  %v167_v2 = vsel %vm152_vm1, %v25_v46, -inf  ;;  %v174_v3 = vsel %vm152_vm1, %v26_v47, -inf }
  0x25   :  { %v508_v4 = vsel %vm39_vm0, %v492_v56, %v272_v60  ;;  %v509_v5 = vsel %vm39_vm0, %v493_v57, %v279_v61  ;;  %v168_v6 = vrot.slane %v167_v2, 4  ;;  %v175_v7 = vrot.slane %v174_v3, 4 }
  0x26   :  { %v525_v8 = vsel %vm524_vm5, %v508_v4, %v385_v62  ;;  %v526_v9 = vsel %vm524_vm5, %v509_v5, %v392_v63  ;;  %v56_v10 = vmax.f32 %v54_v58, %v55_v0  ;;  %v63_v11 = vmax.f32 %v61_v59, %v62_v1 }
  0x27   :  { %v557_v12 = vcombine.low %v525_v8, %v526_v9  ;;  %v169_v13 = vmax.f32 %v167_v2, %v168_v6  ;;  %v176_v14 = vmax.f32 %v174_v3, %v175_v7  ;;  %v280_v15 = vsel %vm265_vm2, %v25_v46, -inf }
  0x28   :  { %v57_v16 = vrot.slane %v56_v10, 2  ;;  %v64_v17 = vrot.slane %v63_v11, 2  ;;  %v281_v18 = vrot.slane %v280_v15, 4  ;;  %v287_v19 = vsel %vm265_vm2, %v26_v47, -inf }
  0x29   :  { %573 = vst [vmem:[#allocation5] sm:$0xff] %v557_v12  ;;  %v170_v20 = vrot.slane %v169_v13, 2  ;;  %v177_v21 = vrot.slane %v176_v14, 2  ;;  %v288_v22 = vrot.slane %v287_v19, 4  ;;  %v393_v23 = vsel %vm378_vm3, %v25_v46, -inf }
  0x2a   :  { %v58_v24 = vmax.f32 %v56_v10, %v57_v16  ;;  %v65_v25 = vmax.f32 %v63_v11, %v64_v17  ;;  %v282_v26 = vmax.f32 %v280_v15, %v281_v18  ;;  %v394_v27 = vrot.slane %v393_v23, 4 }
  0x2b   :  { %v171_v28 = vmax.f32 %v169_v13, %v170_v20  ;;  %v178_v29 = vmax.f32 %v176_v14, %v177_v21  ;;  %v289_v30 = vmax.f32 %v287_v19, %v288_v22  ;;  %v400_v31 = vsel %vm378_vm3, %v26_v47, -inf }
  0x2c   :  { %v59_v32 = vrot.slane %v58_v24, 1  ;;  %v66_v33 = vrot.slane %v65_v25, 1  ;;  %v283_v34 = vrot.slane %v282_v26, 2  ;;  %v395_v35 = vmax.f32 %v393_v23, %v394_v27 }
  0x2d   :  { %v172_v36 = vrot.slane %v171_v28, 1  ;;  %v179_v37 = vrot.slane %v178_v29, 1  ;;  %v290_v38 = vrot.slane %v289_v30, 2  ;;  %v401_v39 = vrot.slane %v400_v31, 4 }
  0x2e   :  { %v60_v42 = vmax.f32 %v58_v24, %v59_v32  ;;  %v67_v43 = vmax.f32 %v65_v25, %v66_v33  ;;  %v284_v44 = vmax.f32 %v282_v26, %v283_v34  ;;  %v396_v45 = vrot.slane %v395_v35, 2  ;;  %v720_v34 = vld [vmem:[#allocation2 + $0x30] sm:$0xff] }
  0x2f   :  { %v173_v46 = vmax.f32 %v171_v28, %v172_v36  ;;  %v180_v48 = vmax.f32 %v178_v29, %v179_v37  ;;  %v291_v49 = vmax.f32 %v289_v30, %v290_v38  ;;  %v402_v50 = vmax.f32 %v400_v31, %v401_v39 }
  0x30   :  { %v285_v47 = vrot.slane %v284_v44, 1  ;;  %v397_v51 = vmax.f32 %v395_v35, %v396_v45  ;;  %v68_v52 = vsel %vm39_vm0, %v27_v40, -inf  ;;  %v75_v53 = vsel %vm39_vm0, %v702_v41, -inf  ;;  %v722_v35 = vld [vmem:[#allocation2 + $0x38] sm:$0xff] }
  0x31   :  { %v292_v54 = vrot.slane %v291_v49, 1  ;;  %v403_v55 = vrot.slane %v402_v50, 2  ;;  %v494_v56 = vsel %vm491_vm4, %v60_v42, %v173_v46  ;;  %v495_v57 = vsel %vm491_vm4, %v67_v43, %v180_v48 }
  0x32   :  { %v286_v58 = vmax.f32 %v284_v44, %v285_v47  ;;  %v398_v59 = vrot.slane %v397_v51, 1  ;;  %v69_v60 = vrot.slane %v68_v52, 4  ;;  %v76_v61 = vrot.slane %v75_v53, 4 }
  0x33   :  { %v293_v62 = vmax.f32 %v291_v49, %v292_v54  ;;  %v404_v63 = vmax.f32 %v402_v50, %v403_v55  ;;  %v181_v0 = vsel %vm152_vm1, %v27_v40, -inf  ;;  %v188_v1 = vsel %vm152_vm1, %v702_v41, -inf }
  0x34   :  { %v399_v2 = vmax.f32 %v397_v51, %v398_v59  ;;  %v510_v3 = vsel %vm39_vm0, %v494_v56, %v286_v58  ;;  %v70_v4 = vmax.f32 %v68_v52, %v69_v60  ;;  %v77_v5 = vmax.f32 %v75_v53, %v76_v61 }
  0x35   :  { %v405_v6 = vrot.slane %v404_v63, 1  ;;  %v511_v7 = vsel %vm39_vm0, %v495_v57, %v293_v62  ;;  %v182_v8 = vrot.slane %v181_v0, 4  ;;  %v189_v9 = vrot.slane %v188_v1, 4 }
  0x36   :  { %v527_v10 = vsel %vm524_vm5, %v510_v3, %v399_v2  ;;  %v71_v11 = vrot.slane %v70_v4, 2  ;;  %v78_v12 = vrot.slane %v77_v5, 2  ;;  %v294_v13 = vsel %vm265_vm2, %v27_v40, -inf }
  0x37   :  { %v406_v14 = vmax.f32 %v404_v63, %v405_v6  ;;  %v183_v15 = vmax.f32 %v181_v0, %v182_v8  ;;  %v190_v16 = vmax.f32 %v188_v1, %v189_v9  ;;  %v295_v17 = vrot.slane %v294_v13, 4 }
  0x38   :  { %v72_v18 = vmax.f32 %v70_v4, %v71_v11  ;;  %v79_v19 = vmax.f32 %v77_v5, %v78_v12  ;;  %v301_v20 = vsel %vm265_vm2, %v702_v41, -inf  ;;  %v407_v21 = vsel %vm378_vm3, %v27_v40, -inf }
  0x39   :  { %v528_v22 = vsel %vm524_vm5, %v511_v7, %v406_v14  ;;  %v184_v23 = vrot.slane %v183_v15, 2  ;;  %v191_v24 = vrot.slane %v190_v16, 2  ;;  %v296_v25 = vmax.f32 %v294_v13, %v295_v17 }
  0x3a   :  { %v558_v26 = vcombine.low %v527_v10, %v528_v22  ;;  %v73_v27 = vrot.slane %v72_v18, 1  ;;  %v80_v28 = vrot.slane %v79_v19, 1  ;;  %v302_v29 = vrot.slane %v301_v20, 4 }
  0x3b   :  { %v185_v30 = vmax.f32 %v183_v15, %v184_v23  ;;  %v192_v31 = vmax.f32 %v190_v16, %v191_v24  ;;  %v297_v32 = vrot.slane %v296_v25, 2  ;;  %v408_v33 = vrot.slane %v407_v21, 4 }
  0x3c   :  { %574 = vst [vmem:[#allocation5 + $0x8] sm:$0xff] %v558_v26  ;;  %v74_v36 = vmax.f32 %v72_v18, %v73_v27  ;;  %v81_v37 = vmax.f32 %v79_v19, %v80_v28  ;;  %v303_v38 = vmax.f32 %v301_v20, %v302_v29  ;;  %v414_v39 = vsel %vm378_vm3, %v702_v41, -inf  ;;  %v743_v28 = vld [vmem:[#allocation2 + $0x40] sm:$0xff] }
  0x3d   :  { %v186_v40 = vrot.slane %v185_v30, 1  ;;  %v193_v42 = vrot.slane %v192_v31, 1  ;;  %v298_v43 = vmax.f32 %v296_v25, %v297_v32  ;;  %v409_v44 = vmax.f32 %v407_v21, %v408_v33 }
  0x3e   :  { %v304_v45 = vrot.slane %v303_v38, 2  ;;  %v415_v46 = vrot.slane %v414_v39, 4  ;;  %v82_v48 = vsel %vm39_vm0, %v720_v34, -inf  ;;  %v89_v49 = vsel %vm39_vm0, %v722_v35, -inf }
  0x3f   :  { %v187_v50 = vmax.f32 %v185_v30, %v186_v40  ;;  %v194_v47 = vmax.f32 %v192_v31, %v193_v42  ;;  %v299_v51 = vrot.slane %v298_v43, 1  ;;  %v410_v52 = vrot.slane %v409_v44, 2 }
  0x40   :  { %v305_v53 = vmax.f32 %v303_v38, %v304_v45  ;;  %v416_v54 = vmax.f32 %v414_v39, %v415_v46  ;;  %v83_v55 = vrot.slane %v82_v48, 4  ;;  %v90_v41 = vrot.slane %v89_v49, 4  ;;  %v748_v39 = vld [vmem:[#allocation2 + $0x48] sm:$0xff] }
  0x41   :  { %v300_v56 = vmax.f32 %v298_v43, %v299_v51  ;;  %v411_v57 = vmax.f32 %v409_v44, %v410_v52  ;;  %v496_v58 = vsel %vm491_vm4, %v74_v36, %v187_v50  ;;  %v497_v59 = vsel %vm491_vm4, %v81_v37, %v194_v47 }
  0x42   :  { %v306_v60 = vrot.slane %v305_v53, 1  ;;  %v417_v61 = vrot.slane %v416_v54, 2  ;;  %v84_v62 = vmax.f32 %v82_v48, %v83_v55  ;;  %v91_v63 = vmax.f32 %v89_v49, %v90_v41 }
  0x43   :  { %v412_v0 = vrot.slane %v411_v57, 1  ;;  %v512_v1 = vsel %vm39_vm0, %v496_v58, %v300_v56  ;;  %v195_v2 = vsel %vm152_vm1, %v720_v34, -inf  ;;  %v202_v3 = vsel %vm152_vm1, %v722_v35, -inf }
  0x44   :  { %v307_v4 = vmax.f32 %v305_v53, %v306_v60  ;;  %v418_v5 = vmax.f32 %v416_v54, %v417_v61  ;;  %v85_v6 = vrot.slane %v84_v62, 2  ;;  %v92_v7 = vrot.slane %v91_v63, 2 }
  0x45   :  { %v413_v8 = vmax.f32 %v411_v57, %v412_v0  ;;  %v196_v9 = vrot.slane %v195_v2, 4  ;;  %v203_v10 = vrot.slane %v202_v3, 4  ;;  %v308_v11 = vsel %vm265_vm2, %v720_v34, -inf }
  0x46   :  { %v419_v12 = vrot.slane %v418_v5, 1  ;;  %v513_v13 = vsel %vm39_vm0, %v497_v59, %v307_v4  ;;  %v86_v14 = vmax.f32 %v84_v62, %v85_v6  ;;  %v93_v15 = vmax.f32 %v91_v63, %v92_v7 }
  0x47   :  { %v529_v16 = vsel %vm524_vm5, %v512_v1, %v413_v8  ;;  %v197_v17 = vmax.f32 %v195_v2, %v196_v9  ;;  %v204_v18 = vmax.f32 %v202_v3, %v203_v10  ;;  %v309_v19 = vrot.slane %v308_v11, 4 }
  0x48   :  { %v420_v20 = vmax.f32 %v418_v5, %v419_v12  ;;  %v87_v21 = vrot.slane %v86_v14, 1  ;;  %v94_v22 = vrot.slane %v93_v15, 1  ;;  %v315_v23 = vsel %vm265_vm2, %v722_v35, -inf }
  0x49   :  { %v198_v24 = vrot.slane %v197_v17, 2  ;;  %v205_v25 = vrot.slane %v204_v18, 2  ;;  %v310_v26 = vmax.f32 %v308_v11, %v309_v19  ;;  %v316_v27 = vrot.slane %v315_v23, 4 }
  0x4a   :  { %v530_v29 = vsel %vm524_vm5, %v513_v13, %v420_v20  ;;  %v88_v30 = vmax.f32 %v86_v14, %v87_v21  ;;  %v95_v31 = vmax.f32 %v93_v15, %v94_v22  ;;  %v421_v32 = vsel %vm378_vm3, %v720_v34, -inf }
  0x4b   :  { %v559_v33 = vcombine.low %v529_v16, %v530_v29  ;;  %v199_v36 = vmax.f32 %v197_v17, %v198_v24  ;;  %v206_v37 = vmax.f32 %v204_v18, %v205_v25  ;;  %v311_v38 = vrot.slane %v310_v26, 2 }
  0x4c   :  { %v317_v40 = vmax.f32 %v315_v23, %v316_v27  ;;  %v422_v42 = vrot.slane %v421_v32, 4  ;;  %v428_v43 = vsel %vm378_vm3, %v722_v35, -inf  ;;  %v96_v44 = vsel %vm39_vm0, %v743_v28, -inf }
  0x4d   :  { %575 = vst [vmem:[#allocation5 + $0x10] sm:$0xff] %v559_v33  ;;  %v200_v45 = vrot.slane %v199_v36, 1  ;;  %v207_v46 = vrot.slane %v206_v37, 1  ;;  %v312_v48 = vmax.f32 %v310_v26, %v311_v38  ;;  %v429_v49 = vrot.slane %v428_v43, 4 }
  0x4e   :  { %v318_v34 = vrot.slane %v317_v40, 2  ;;  %v423_v50 = vmax.f32 %v421_v32, %v422_v42  ;;  %v97_v47 = vrot.slane %v96_v44, 4  ;;  %v103_v51 = vsel %vm39_vm0, %v748_v39, -inf  ;;  %v772_v32 = vld [vmem:[#allocation2 + $0x58] sm:$0xff] }
  0x4f   :  { %v201_v52 = vmax.f32 %v199_v36, %v200_v45  ;;  %v208_v53 = vmax.f32 %v206_v37, %v207_v46  ;;  %v313_v54 = vrot.slane %v312_v48, 1  ;;  %v430_v55 = vmax.f32 %v428_v43, %v429_v49 }
  0x50   :  { %v319_v41 = vmax.f32 %v317_v40, %v318_v34  ;;  %v424_v35 = vrot.slane %v423_v50, 2  ;;  %v98_v56 = vmax.f32 %v96_v44, %v97_v47  ;;  %v104_v57 = vrot.slane %v103_v51, 4 }
  0x51   :  { %v314_v58 = vmax.f32 %v312_v48, %v313_v54  ;;  %v431_v59 = vrot.slane %v430_v55, 2  ;;  %v498_v60 = vsel %vm491_vm4, %v88_v30, %v201_v52  ;;  %v499_v61 = vsel %vm491_vm4, %v95_v31, %v208_v53  ;;  %v770_v31 = vld [vmem:[#allocation2 + $0x50] sm:$0xff] }
  0x52   :  { %v320_v62 = vrot.slane %v319_v41, 1  ;;  %v425_v63 = vmax.f32 %v423_v50, %v424_v35  ;;  %v99_v0 = vrot.slane %v98_v56, 2  ;;  %v105_v1 = vmax.f32 %v103_v51, %v104_v57 }
  0x53   :  { %v432_v2 = vmax.f32 %v430_v55, %v431_v59  ;;  %v514_v3 = vsel %vm39_vm0, %v498_v60, %v314_v58  ;;  %v209_v4 = vsel %vm152_vm1, %v743_v28, -inf  ;;  %v216_v5 = vsel %vm152_vm1, %v748_v39, -inf }
  0x54   :  { %v321_v6 = vmax.f32 %v319_v41, %v320_v62  ;;  %v426_v7 = vrot.slane %v425_v63, 1  ;;  %v100_v8 = vmax.f32 %v98_v56, %v99_v0  ;;  %v106_v9 = vrot.slane %v105_v1, 2 }
  0x55   :  { %v433_v10 = vrot.slane %v432_v2, 1  ;;  %v210_v11 = vrot.slane %v209_v4, 4  ;;  %v217_v12 = vrot.slane %v216_v5, 4  ;;  %v322_v13 = vsel %vm265_vm2, %v743_v28, -inf }
  0x56   :  { %v427_v14 = vmax.f32 %v425_v63, %v426_v7  ;;  %v515_v15 = vsel %vm39_vm0, %v499_v61, %v321_v6  ;;  %v101_v16 = vrot.slane %v100_v8, 1  ;;  %v107_v17 = vmax.f32 %v105_v1, %v106_v9 }
  0x57   :  { %v434_v18 = vmax.f32 %v432_v2, %v433_v10  ;;  %v211_v19 = vmax.f32 %v209_v4, %v210_v11  ;;  %v218_v20 = vmax.f32 %v216_v5, %v217_v12  ;;  %v323_v21 = vrot.slane %v322_v13, 4 }
  0x58   :  { %v531_v22 = vsel %vm524_vm5, %v514_v3, %v427_v14  ;;  %v102_v23 = vmax.f32 %v100_v8, %v101_v16  ;;  %v108_v24 = vrot.slane %v107_v17, 1  ;;  %v329_v25 = vsel %vm265_vm2, %v748_v39, -inf }
  0x59   :  { %v532_v26 = vsel %vm524_vm5, %v515_v15, %v434_v18  ;;  %v212_v27 = vrot.slane %v211_v19, 2  ;;  %v219_v29 = vrot.slane %v218_v20, 2  ;;  %v324_v30 = vmax.f32 %v322_v13, %v323_v21 }
  0x5a   :  { %v560_v33 = vcombine.low %v531_v22, %v532_v26  ;;  %v109_v36 = vmax.f32 %v107_v17, %v108_v24  ;;  %v330_v37 = vrot.slane %v329_v25, 4  ;;  %v435_v38 = vsel %vm378_vm3, %v743_v28, -inf  ;;  %v793_v24 = vld [vmem:[#allocation2 + $0x60] sm:$0xff] }
  0x5b   :  { %v213_v40 = vmax.f32 %v211_v19, %v212_v27  ;;  %v220_v42 = vmax.f32 %v218_v20, %v219_v29  ;;  %v325_v43 = vrot.slane %v324_v30, 2  ;;  %v436_v44 = vrot.slane %v435_v38, 4 }
  0x5c   :  { %576 = vst [vmem:[#allocation5 + $0x18] sm:$0xff] %v560_v33  ;;  %v331_v45 = vmax.f32 %v329_v25, %v330_v37  ;;  %v442_v46 = vsel %vm378_vm3, %v748_v39, -inf  ;;  %v110_v48 = vsel %vm39_vm0, %v770_v31, -inf  ;;  %v117_v49 = vsel %vm39_vm0, %v772_v32, -inf }
  0x5d   :  { %v214_v34 = vrot.slane %v213_v40, 1  ;;  %v221_v50 = vrot.slane %v220_v42, 1  ;;  %v326_v47 = vmax.f32 %v324_v30, %v325_v43  ;;  %v437_v51 = vmax.f32 %v435_v38, %v436_v44  ;;  %v802_v43 = vld [vmem:[#allocation2 + $0x68] sm:$0xff] }
  0x5e   :  { %v332_v28 = vrot.slane %v331_v45, 2  ;;  %v443_v52 = vrot.slane %v442_v46, 4  ;;  %v111_v53 = vrot.slane %v110_v48, 4  ;;  %v118_v54 = vrot.slane %v117_v49, 4 }
  0x5f   :  { %v215_v55 = vmax.f32 %v213_v40, %v214_v34  ;;  %v222_v41 = vmax.f32 %v220_v42, %v221_v50  ;;  %v327_v35 = vrot.slane %v326_v47, 1  ;;  %v438_v56 = vrot.slane %v437_v51, 2 }
  0x60   :  { %v333_v57 = vmax.f32 %v331_v45, %v332_v28  ;;  %v444_v39 = vmax.f32 %v442_v46, %v443_v52  ;;  %v112_v58 = vmax.f32 %v110_v48, %v111_v53  ;;  %v119_v59 = vmax.f32 %v117_v49, %v118_v54 }
  0x61   :  { %v328_v60 = vmax.f32 %v326_v47, %v327_v35  ;;  %v439_v61 = vmax.f32 %v437_v51, %v438_v56  ;;  %v500_v62 = vsel %vm491_vm4, %v102_v23, %v215_v55  ;;  %v501_v63 = vsel %vm491_vm4, %v109_v36, %v222_v41 }
  0x62   :  { %v334_v0 = vrot.slane %v333_v57, 1  ;;  %v445_v1 = vrot.slane %v444_v39, 2  ;;  %v113_v2 = vrot.slane %v112_v58, 2  ;;  %v120_v3 = vrot.slane %v119_v59, 2 }
  0x63   :  { %v440_v4 = vrot.slane %v439_v61, 1  ;;  %v516_v5 = vsel %vm39_vm0, %v500_v62, %v328_v60  ;;  %v223_v6 = vsel %vm152_vm1, %v770_v31, -inf  ;;  %v230_v7 = vsel %vm152_vm1, %v772_v32, -inf }
  0x64   :  { %v335_v8 = vmax.f32 %v333_v57, %v334_v0  ;;  %v446_v9 = vmax.f32 %v444_v39, %v445_v1  ;;  %v114_v10 = vmax.f32 %v112_v58, %v113_v2  ;;  %v121_v11 = vmax.f32 %v119_v59, %v120_v3 }
  0x65   :  { %v441_v12 = vmax.f32 %v439_v61, %v440_v4  ;;  %v224_v13 = vrot.slane %v223_v6, 4  ;;  %v231_v14 = vrot.slane %v230_v7, 4  ;;  %v336_v15 = vsel %vm265_vm2, %v770_v31, -inf }
  0x66   :  { %v447_v16 = vrot.slane %v446_v9, 1  ;;  %v517_v17 = vsel %vm39_vm0, %v501_v63, %v335_v8  ;;  %v115_v18 = vrot.slane %v114_v10, 1  ;;  %v122_v19 = vrot.slane %v121_v11, 1 }
  0x67   :  { %v533_v20 = vsel %vm524_vm5, %v516_v5, %v441_v12  ;;  %v225_v21 = vmax.f32 %v223_v6, %v224_v13  ;;  %v232_v22 = vmax.f32 %v230_v7, %v231_v14  ;;  %v337_v23 = vrot.slane %v336_v15, 4 }
  0x68   :  { %v448_v25 = vmax.f32 %v446_v9, %v447_v16  ;;  %v116_v26 = vmax.f32 %v114_v10, %v115_v18  ;;  %v123_v27 = vmax.f32 %v121_v11, %v122_v19  ;;  %v343_v29 = vsel %vm265_vm2, %v772_v32, -inf }
  0x69   :  { %v226_v30 = vrot.slane %v225_v21, 2  ;;  %v233_v33 = vrot.slane %v232_v22, 2  ;;  %v338_v36 = vmax.f32 %v336_v15, %v337_v23  ;;  %v344_v37 = vrot.slane %v343_v29, 4 }
  0x6a   :  { %v534_v38 = vsel %vm524_vm5, %v517_v17, %v448_v25  ;;  %v449_v40 = vsel %vm378_vm3, %v770_v31, -inf  ;;  %v456_v42 = vsel %vm378_vm3, %v772_v32, -inf  ;;  %v124_v44 = vsel %vm39_vm0, %v793_v24, -inf }
  0x6b   :  { %v561_v45 = vcombine.low %v533_v20, %v534_v38  ;;  %v227_v46 = vmax.f32 %v225_v21, %v226_v30  ;;  %v234_v48 = vmax.f32 %v232_v22, %v233_v33  ;;  %v339_v49 = vrot.slane %v338_v36, 2 }
  0x6c   :  { %v345_v34 = vmax.f32 %v343_v29, %v344_v37  ;;  %v450_v50 = vrot.slane %v449_v40, 4  ;;  %v457_v47 = vrot.slane %v456_v42, 4  ;;  %v125_v51 = vrot.slane %v124_v44, 4 }
  0x6d   :  { %577 = vst [vmem:[#allocation5 + $0x20] sm:$0xff] %v561_v45  ;;  %v228_v28 = vrot.slane %v227_v46, 1  ;;  %v235_v52 = vrot.slane %v234_v48, 1  ;;  %v340_v31 = vmax.f32 %v338_v36, %v339_v49  ;;  %v131_v32 = vsel %vm39_vm0, %v802_v43, -inf  ;;  %v824_v36 = vld [vmem:[#allocation2 + $0x70] sm:$0xff]  ;;  %v828_v49 = vld [vmem:[#allocation2 + $0x78] sm:$0xff] }
  0x6e   :  { %v346_v53 = vrot.slane %v345_v34, 2  ;;  %v451_v54 = vmax.f32 %v449_v40, %v450_v50  ;;  %v458_v55 = vmax.f32 %v456_v42, %v457_v47  ;;  %v126_v41 = vmax.f32 %v124_v44, %v125_v51 }
  0x6f   :  { %v229_v35 = vmax.f32 %v227_v46, %v228_v28  ;;  %v236_v56 = vmax.f32 %v234_v48, %v235_v52  ;;  %v341_v57 = vrot.slane %v340_v31, 1  ;;  %v132_v39 = vrot.slane %v131_v32, 4 }
  0x70   :  { %v347_v58 = vmax.f32 %v345_v34, %v346_v53  ;;  %v452_v59 = vrot.slane %v451_v54, 2  ;;  %v459_v60 = vrot.slane %v458_v55, 2  ;;  %v127_v61 = vrot.slane %v126_v41, 2 }
  0x71   :  { %v342_v62 = vmax.f32 %v340_v31, %v341_v57  ;;  %v502_v63 = vsel %vm491_vm4, %v116_v26, %v229_v35  ;;  %v503_v0 = vsel %vm491_vm4, %v123_v27, %v236_v56  ;;  %v133_v1 = vmax.f32 %v131_v32, %v132_v39 }
  0x72   :  { %v348_v2 = vrot.slane %v347_v58, 1  ;;  %v453_v3 = vmax.f32 %v451_v54, %v452_v59  ;;  %v460_v4 = vmax.f32 %v458_v55, %v459_v60  ;;  %v128_v5 = vmax.f32 %v126_v41, %v127_v61 }
  0x73   :  { %v518_v6 = vsel %vm39_vm0, %v502_v63, %v342_v62  ;;  %v134_v7 = vrot.slane %v133_v1, 2  ;;  %v237_v8 = vsel %vm152_vm1, %v793_v24, -inf  ;;  %v244_v9 = vsel %vm152_vm1, %v802_v43, -inf }
  0x74   :  { %v349_v10 = vmax.f32 %v347_v58, %v348_v2  ;;  %v454_v11 = vrot.slane %v453_v3, 1  ;;  %v461_v12 = vrot.slane %v460_v4, 1  ;;  %v129_v13 = vrot.slane %v128_v5, 1 }
  0x75   :  { %v135_v14 = vmax.f32 %v133_v1, %v134_v7  ;;  %v238_v15 = vrot.slane %v237_v8, 4  ;;  %v245_v16 = vrot.slane %v244_v9, 4  ;;  %v350_v17 = vsel %vm265_vm2, %v793_v24, -inf }
  0x76   :  { %v455_v18 = vmax.f32 %v453_v3, %v454_v11  ;;  %v462_v19 = vmax.f32 %v460_v4, %v461_v12  ;;  %v519_v20 = vsel %vm39_vm0, %v503_v0, %v349_v10  ;;  %v130_v21 = vmax.f32 %v128_v5, %v129_v13 }
  0x77   :  { %v136_v22 = vrot.slane %v135_v14, 1  ;;  %v239_v23 = vmax.f32 %v237_v8, %v238_v15  ;;  %v246_v25 = vmax.f32 %v244_v9, %v245_v16  ;;  %v351_v26 = vrot.slane %v350_v17, 4 }
  0x78   :  { %v535_v27 = vsel %vm524_vm5, %v518_v6, %v455_v18  ;;  %v536_v29 = vsel %vm524_vm5, %v519_v20, %v462_v19  ;;  %v357_v30 = vsel %vm265_vm2, %v802_v43, -inf  ;;  %v463_v33 = vsel %vm378_vm3, %v793_v24, -inf }
  0x79   :  { %v562_v37 = vcombine.low %v535_v27, %v536_v29  ;;  %v137_v38 = vmax.f32 %v135_v14, %v136_v22  ;;  %v240_v40 = vrot.slane %v239_v23, 2  ;;  %v247_v42 = vrot.slane %v246_v25, 2 }
  0x7a   :  { %v352_v44 = vmax.f32 %v350_v17, %v351_v26  ;;  %v358_v45 = vrot.slane %v357_v30, 4  ;;  %v464_v46 = vrot.slane %v463_v33, 4  ;;  %v470_v48 = vsel %vm378_vm3, %v802_v43, -inf }
  0x7b   :  { %578 = vst [vmem:[#allocation5 + $0x28] sm:$0xff] %v562_v37  ;;  %v241_v34 = vmax.f32 %v239_v23, %v240_v40  ;;  %v248_v50 = vmax.f32 %v246_v25, %v247_v42  ;;  %v471_v47 = vrot.slane %v470_v48, 4  ;;  %v138_v24 = vsel %vm39_vm0, %v824_v36, -inf }
  0x7c   :  { %v353_v51 = vrot.slane %v352_v44, 2  ;;  %v359_v28 = vmax.f32 %v357_v30, %v358_v45  ;;  %v465_v52 = vmax.f32 %v463_v33, %v464_v46  ;;  %v139_v31 = vrot.slane %v138_v24, 4 }
  0x7d   :  { %v242_v32 = vrot.slane %v241_v34, 1  ;;  %v249_v53 = vrot.slane %v248_v50, 1  ;;  %v472_v54 = vmax.f32 %v470_v48, %v471_v47  ;;  %v145_v55 = vsel %vm39_vm0, %v828_v49, -inf }
  0x7e   :  { %v354_v43 = vmax.f32 %v352_v44, %v353_v51  ;;  %v360_v41 = vrot.slane %v359_v28, 2  ;;  %v466_v35 = vrot.slane %v465_v52, 2  ;;  %v140_v56 = vmax.f32 %v138_v24, %v139_v31 }
  0x7f   :  { %v243_v57 = vmax.f32 %v241_v34, %v242_v32  ;;  %v250_v39 = vmax.f32 %v248_v50, %v249_v53  ;;  %v473_v58 = vrot.slane %v472_v54, 2  ;;  %v146_v59 = vrot.slane %v145_v55, 4 }
  0x80   :  { %v355_v60 = vrot.slane %v354_v43, 1  ;;  %v361_v61 = vmax.f32 %v359_v28, %v360_v41  ;;  %v467_v62 = vmax.f32 %v465_v52, %v466_v35  ;;  %v141_v63 = vrot.slane %v140_v56, 2 }
  0x81   :  { %v474_v0 = vmax.f32 %v472_v54, %v473_v58  ;;  %v504_v1 = vsel %vm491_vm4, %v130_v21, %v243_v57  ;;  %v505_v2 = vsel %vm491_vm4, %v137_v38, %v250_v39  ;;  %v147_v3 = vmax.f32 %v145_v55, %v146_v59 }
  0x82   :  { %v356_v4 = vmax.f32 %v354_v43, %v355_v60  ;;  %v362_v5 = vrot.slane %v361_v61, 1  ;;  %v468_v6 = vrot.slane %v467_v62, 1  ;;  %v142_v7 = vmax.f32 %v140_v56, %v141_v63 }
  0x83   :  { %v475_v8 = vrot.slane %v474_v0, 1  ;;  %v148_v9 = vrot.slane %v147_v3, 2  ;;  %v251_v10 = vsel %vm152_vm1, %v824_v36, -inf  ;;  %v258_v11 = vsel %vm152_vm1, %v828_v49, -inf }
  0x84   :  { %v363_v12 = vmax.f32 %v361_v61, %v362_v5  ;;  %v469_v13 = vmax.f32 %v467_v62, %v468_v6  ;;  %v520_v14 = vsel %vm39_vm0, %v504_v1, %v356_v4  ;;  %v252_v16 = vrot.slane %v251_v10, 4 }
  0x85   :  { %v476_v15 = vmax.f32 %v474_v0, %v475_v8  ;;  %v259_v17 = vrot.slane %v258_v11, 4  ;;  %v149_v20 = vmax.f32 %v147_v3, %v148_v9  ;;  %v364_v21 = vsel %vm265_vm2, %v824_v36, -inf }
  0x86   :  { %v521_v18 = vsel %vm39_vm0, %v505_v2, %v363_v12  ;;  %v537_v19 = vsel %vm524_vm5, %v520_v14, %v469_v13  ;;  %v143_v23 = vrot.slane %v142_v7, 1  ;;  %v253_v25 = vmax.f32 %v251_v10, %v252_v16 }
  0x87   :  { %v538_v22 = vsel %vm524_vm5, %v521_v18, %v476_v15  ;;  %v260_v26 = vmax.f32 %v258_v11, %v259_v17  ;;  %v365_v29 = vrot.slane %v364_v21, 4  ;;  %v371_v30 = vsel %vm265_vm2, %v828_v49, -inf }
  0x88   :  { %v563_v27 = vcombine.low %v537_v19, %v538_v22  ;;  %v477_v33 = vsel %vm378_vm3, %v824_v36, -inf  ;;  %v254_v37 = vrot.slane %v253_v25, 2  ;;  %v372_v40 = vrot.slane %v371_v30, 4 }
  0x89   :  { %v261_v38 = vrot.slane %v260_v26, 2  ;;  %v150_v42 = vrot.slane %v149_v20, 1  ;;  %v366_v44 = vmax.f32 %v364_v21, %v365_v29  ;;  %v478_v45 = vrot.slane %v477_v33, 4 }
  0x8a   :  { %579 = vst [vmem:[#allocation5 + $0x30] sm:$0xff] %v563_v27  ;;  %v484_v46 = vsel %vm378_vm3, %v828_v49, -inf  ;;  %v255_v48 = vmax.f32 %v253_v25, %v254_v37  ;;  %v373_v50 = vmax.f32 %v371_v30, %v372_v40  ;;  %v144_v24 = vmax.f32 %v142_v7, %v143_v23 }
  0x8b   :  { %v262_v34 = vmax.f32 %v260_v26, %v261_v38  ;;  %v485_v47 = vrot.slane %v484_v46, 4  ;;  %v367_v51 = vrot.slane %v366_v44, 2  ;;  %v479_v28 = vmax.f32 %v477_v33, %v478_v45 }
  0x8c   :  { %v256_v52 = vrot.slane %v255_v48, 1  ;;  %v374_v36 = vrot.slane %v373_v50, 2  ;;  %v151_v53 = vmax.f32 %v149_v20, %v150_v42 }
  0x8d   :  { %v263_v31 = vrot.slane %v262_v34, 1  ;;  %v486_v32 = vmax.f32 %v484_v46, %v485_v47  ;;  %v368_v54 = vmax.f32 %v366_v44, %v367_v51  ;;  %v480_v55 = vrot.slane %v479_v28, 2 }
  0x8e   :  { %v257_v43 = vmax.f32 %v255_v48, %v256_v52  ;;  %v375_v35 = vmax.f32 %v373_v50, %v374_v36 }
  0x8f   :  { %v264_v41 = vmax.f32 %v262_v34, %v263_v31  ;;  %v487_v56 = vrot.slane %v486_v32, 2  ;;  %v369_v57 = vrot.slane %v368_v54, 1  ;;  %v481_v49 = vmax.f32 %v479_v28, %v480_v55 }
  0x90   :  { %v376_v39 = vrot.slane %v375_v35, 1  ;;  %v506_v59 = vsel %vm491_vm4, %v144_v24, %v257_v43 }
  0x91   :  { %v488_v58 = vmax.f32 %v486_v32, %v487_v56  ;;  %v370_v60 = vmax.f32 %v368_v54, %v369_v57  ;;  %v482_v61 = vrot.slane %v481_v49, 1  ;;  %v507_v62 = vsel %vm491_vm4, %v151_v53, %v264_v41 }
  0x92   :  { %v377_v63 = vmax.f32 %v375_v35, %v376_v39 }
  0x93   :  { %v489_v0 = vrot.slane %v488_v58, 1  ;;  %v483_v1 = vmax.f32 %v481_v49, %v482_v61  ;;  %v522_v2 = vsel %vm39_vm0, %v506_v59, %v370_v60 }
  0x94   :  { %v523_v4 = vsel %vm39_vm0, %v507_v62, %v377_v63 }
  0x95   :  { %v490_v3 = vmax.f32 %v488_v58, %v489_v0  ;;  %v539_v5 = vsel %vm524_vm5, %v522_v2, %v483_v1 }
  0x97   :  { %v540_v6 = vsel %vm524_vm5, %v523_v4, %v490_v3 }
  0x98   :  { %v564_v7 = vcombine.low %v539_v5, %v540_v6 }
  0x9a   :  { %580 = vst [vmem:[#allocation5 + $0x38] sm:$0xff] %v564_v7 }
  0x9b   :  { %637 = shalt.err (!%p634_p12)
}
  0x9c   :  { %s638_s24 = scalar_lea.hbm %s871_s1, 1024 }
  0x9d   :  { %p639_p13 = scmp.ne.s32.totalorder %s871_s1, %s638_s24  ;;  %p642_p0 = scmp.lt.u32.totalorder %s638_s24, %s871_s1 }
  0x9f   :  { %p644_p1 = pnand %p642_p0, %p639_p13 }
  0xa1   :  { %647 = shalt.err (!%p644_p1)
}
  0xa2   :  { %s656_s29 = smov 512   ;;  %s657_s30 = smov 32  }
  0xa3   :  { %592 = dma.vmem_to_hbm [thread:$0]  %s587_s20, 1024, %s871_s1, [#allocation4], %s656_s29, %s656_s29, %s657_s30  }
  0xa4   :  { %650 = dma.done.wait [#allocation4], 1024  }
  0xa5   :  { %651 = vsyncadd [#allocation4], 4294966272 }
  0xa6   :  { %596 = vsyncpa [#allocation3], 1 }
  0xa7   :  { %597 = vsyncpa [#allocation4], 1 }

</bundles_post_ra>
